<compile_context>
chip_gen: v7x
topology: tpu7x:2x2x1
jax: 0.10.0
libtpu: 0.0.40
codegen_flags: <defaults>
</compile_context>

<pallas_src>
import functools

import jax
import jax.numpy as jnp
from jax.experimental import pallas as pl
from jax.experimental.pallas import tpu as pltpu


# Lane choices keep the output last dim a multiple of 128 -> full, unmasked vst.
_LANE_CHOICES = (1024, 512, 256, 128)
# Row granule for tiled blocks: multiple of the sublane tiling for
# f32 (8), bf16 (16) and int8/fp8 (32).
_ROW_GRANULE = 32
# Whole-array single-block path: in + out buffers of up to this padded VMEM
# footprint each (2 x 6 MiB = 12 MiB) fit every generation's default scoped
# VMEM (v5e 16 MiB, v6e/v7x 32 MiB) with headroom.
_SMALL_BLOCK_VMEM_BYTES = 6 << 20


def _round_up(v: int, m: int) -> int:
    return -(-v // m) * m


def _round_down(v: int, m: int) -> int:
    return (v // m) * m


@functools.lru_cache(maxsize=None)
def _tile_config():
    """(tile_bytes, vmem_limit_bytes) byte-budgeted per TPU generation.

    The copy is purely DMA/HBM-bound, so tile bytes are the only in-kernel
    lever.  v7x (~3.2 TB/s) needs big tiles to amortize the ~0.35 us per-step
    overhead; v5e (~0.8 TB/s) already spends ~5 us/step on a 2 MiB tile, so
    larger tiles buy nothing there and 4 x 2 MiB stays under its 16 MiB
    default scoped-VMEM limit.
    """
    try:
        kind = jax.devices()[0].device_kind.lower()
    except Exception:  # pragma: no cover - be conservative if the query fails
        kind = ""
    if "v7" in kind:
        # 4 live buffers (in + out, double-buffered) x 8 MiB = 32 MiB: exceeds
        # the 32 MiB default scoped VMEM, so raise the limit explicitly
        # (fits comfortably in v7x's 64 MiB physical VMEM).
        return 8 << 20, 40 << 20
    if "v6" in kind:
        return 4 << 20, 24 << 20
    # v5e / unknown generation: conservative; default scoped limit suffices.
    return 2 << 20, None


def _padded_vmem_bytes(shape, itemsize: int) -> int:
    """Conservative VMEM footprint of one whole-array block (tiled layout)."""
    dims = (1, 1) + tuple(int(d) for d in shape)
    lead = 1
    for d in dims[:-2]:
        lead *= d
    return lead * _round_up(dims[-2], _ROW_GRANULE) * _round_up(dims[-1], 128) * itemsize


def _identity_copy_kernel(x_ref, o_ref):
    # Identity forward: pure copy of the current tile.
    o_ref[...] = x_ref[...]


def _copy_whole_array(x: jax.Array) -> jax.Array:
    """Small / awkward shapes: one whole-array block.  No reshape, no padding,
    no trailing slice -> exactly one HBM read + write pass."""
    shape = x.shape
    if x.ndim < 2:  # give Mosaic at least a 2-D view
        x = x.reshape((1,) * (2 - x.ndim) + shape)
    out = pl.pallas_call(
        _identity_copy_kernel,
        out_shape=jax.ShapeDtypeStruct(x.shape, x.dtype),
    )(x)
    return out.reshape(shape)


def _copy_tiled_2d(x2d: jax.Array, tile_bytes: int, vmem_limit) -> jax.Array:
    """Large arrays: lane-dense, row-tiled, double-buffered HBM copy."""
    rows, lane = x2d.shape
    itemsize = jnp.dtype(x2d.dtype).itemsize

    # Byte-budgeted tile (not a fixed row count), rounded to the sublane
    # granule and capped at the array extent.
    block_rows = _round_down(tile_bytes // (lane * itemsize), _ROW_GRANULE)
    block_rows = max(_ROW_GRANULE, min(block_rows, _round_up(rows, _ROW_GRANULE)))
    # Keep >= 2 grid steps when there is enough data so ("parallel",) can
    # split steps across the two TensorCores on v7x and DMAs overlap.
    if rows > _ROW_GRANULE and pl.cdiv(rows, block_rows) < 2:
        block_rows = max(_ROW_GRANULE, _round_up(_round_up(rows, 2) // 2, _ROW_GRANULE))
    grid = (pl.cdiv(rows, block_rows),)  # ragged last block handled by Pallas

    if vmem_limit is not None:
        compiler_params = pltpu.CompilerParams(
            dimension_semantics=("parallel",), vmem_limit_bytes=vmem_limit)
    else:
        compiler_params = pltpu.CompilerParams(dimension_semantics=("parallel",))

    return pl.pallas_call(
        _identity_copy_kernel,
        out_shape=jax.ShapeDtypeStruct((rows, lane), x2d.dtype),
        grid=grid,
        in_specs=[pl.BlockSpec((block_rows, lane), lambda i: (i, 0))],
        out_specs=pl.BlockSpec((block_rows, lane), lambda i: (i, 0)),
        compiler_params=compiler_params,
        cost_estimate=pl.CostEstimate(
            flops=0, transcendentals=0,
            bytes_accessed=2 * rows * lane * itemsize),
    )(x2d)


def _identity_copy(x: jax.Array) -> jax.Array:
    """Materialized Identity: Pallas copy of x into a fresh buffer."""
    if x.size == 0:
        return x
    itemsize = jnp.dtype(x.dtype).itemsize

    # Small inputs (including awkward shapes like (3,5,7,11)): single
    # whole-array block -> no wrapper-side pad / slice / reshape passes.
    if _padded_vmem_bytes(x.shape, itemsize) <= _SMALL_BLOCK_VMEM_BYTES:
        return _copy_whole_array(x)

    tile_bytes, vmem_limit = _tile_config()
    total = x.size
    flat = x.reshape(-1)

    lane = next((l for l in _LANE_CHOICES if total % l == 0), None)
    if lane is not None:
        # Lane-dense 2D view with no padding; uneven row counts are covered by
        # grid = cdiv(rows, block_rows) (Pallas masks the ragged last block),
        # so no jnp.pad and no trailing out[:total] slice.
        out = _copy_tiled_2d(flat.reshape(total // lane, lane), tile_bytes, vmem_limit)
        return out.reshape(x.shape)

    # Rare: a large array whose element count is not a multiple of 128.  Copy
    # the lane-aligned bulk through Pallas and carry the (< lane)-element tail
    # along; the concatenate costs one extra pass over the bulk only.
    # TODO(synk): fold the tail into the kernel (masked store on the last tile
    # driven by a scalar-prefetched total) to make this path single-pass too.
    lane = 1024 if total >= 1024 else 128
    bulk = (total // lane) * lane
    bulk_out = _copy_tiled_2d(
        flat[:bulk].reshape(bulk // lane, lane), tile_bytes, vmem_limit)
    return jnp.concatenate([bulk_out.reshape(-1), flat[bulk:]]).reshape(x.shape)


def identity(x: jax.Array, *, materialize: bool = False) -> jax.Array:
    """Pallas implementation of Identity.forward.

    The true forward is `return x`, so by default no kernel runs (eliding the
    copy removes all HBM traffic).  Pass materialize=True to produce a fresh
    output buffer via the Pallas copy kernel (the result never aliases x).
    """
    if not materialize:
        return x
    return _identity_copy(x)


if __name__ == "__main__":
    key = jax.random.PRNGKey(0)
    # Small NCHW input consistent with a ResNet-style feature map.
    x = jax.random.normal(key, (2, 4, 16, 16), dtype=jnp.float32)

    # Fast path: Identity is a no-op (dominant optimization: no copy at all).
    y = identity(x)
    jax.block_until_ready(y)
    assert y.shape == x.shape and y.dtype == x.dtype
    assert bool(jnp.all(y == x))

    # Materialized path: small input -> single whole-array block kernel.
    y_copy = identity(x, materialize=True)
    jax.block_until_ready(y_copy)
    assert y_copy.shape == x.shape and y_copy.dtype == x.dtype
    assert bool(jnp.all(y_copy == x))

    # Awkward shape / other dtype: still one whole-array block, so no
    # wrapper-side pad or slice passes at all.
    for shape, dt in (((3, 5, 7, 11), jnp.float32), ((2, 4, 16, 16), jnp.bfloat16)):
        xi = jax.random.normal(jax.random.PRNGKey(1), shape).astype(dt)
        yi = identity(xi, materialize=True)
        jax.block_until_ready(yi)
        assert yi.shape == xi.shape and yi.dtype == xi.dtype
        assert bool(jnp.all(yi == xi))

    # Larger lane-aligned input: exercises the byte-budgeted tiled path
    # (grid >= 2 on every generation).
    xl = jax.random.normal(jax.random.PRNGKey(2), (3, 32, 256, 256), dtype=jnp.float32)
    yl = identity(xl, materialize=True)
    jax.block_until_ready(yl)
    assert yl.shape == xl.shape and bool(jnp.all(yl == xl))

    # Larger input whose element count is NOT a multiple of 128: bulk + tail.
    xa = jax.random.normal(jax.random.PRNGKey(3), (1237, 2051), dtype=jnp.float32)
    ya = identity(xa, materialize=True)
    jax.block_until_ready(ya)
    assert ya.shape == xa.shape and bool(jnp.all(ya == xa))

    print("KERNEL_OK")
</pallas_src>

<mosaic_0001>
module attributes {stable_mosaic.version = 11 : i64} {
  func.func @_identity_copy_kernel(%arg0: memref<2x4x16x16xf32, #tpu.memory_space<vmem>>, %arg1: memref<2x4x16x16xf32, #tpu.memory_space<vmem>>) attributes {dimension_semantics = [], scalar_prefetch = 0 : i64, scratch_operands = 0 : i64, tpu.core_type = #tpu.core_type<tc>} {
    %c0 = arith.constant 0 : index
    %c0_0 = arith.constant 0 : index
    %c0_1 = arith.constant 0 : index
    %c0_2 = arith.constant 0 : index
    %0 = vector.load %arg0[%c0, %c0_0, %c0_1, %c0_2] : memref<2x4x16x16xf32, #tpu.memory_space<vmem>>, vector<2x4x16x16xf32>
    %c0_3 = arith.constant 0 : index
    %c0_4 = arith.constant 0 : index
    %c0_5 = arith.constant 0 : index
    %c0_6 = arith.constant 0 : index
    %1 = vector.load %arg1[%c0_3, %c0_4, %c0_5, %c0_6] : memref<2x4x16x16xf32, #tpu.memory_space<vmem>>, vector<2x4x16x16xf32>
    tpu.vector_store %arg1[%c0_3, %c0_4, %c0_5, %c0_6], %0 {strides = array<i32>} : memref<2x4x16x16xf32, #tpu.memory_space<vmem>>, vector<2x4x16x16xf32>,
    return
  }
}

</mosaic_0001>

<bundles_post_ra>
// kernel: tpu_custom_call.1
= control target key start
LH: loop header
LB: loop body
LE: loop exit
PB: predicated region body
PF: predicated region fallthrough
CT: control target
= control target key end

     0   :  { %6 = vsyncpa [#allocation3], 0  ;;  %s185_s0 = inlined_call_operand.hbm [shape: f32[2,4,16,16], index: 0, kind: input, shape index: {}]   ;;  %s186_s1 = inlined_call_operand.hbm [shape: f32[2,4,16,16], index: 1, kind: output, shape index: {}]  }
   0x1   :  { %7 = vsyncpa [#allocation4], 0  ;;  %s125_s6 = smov [#allocation2]   ;;  %s77_s10 = scalar_lea.hbm %s185_s0, 2048 }
   0x2   :  { %s13_s7 = sshll.u32 %s125_s6, 4  ;;  %p78_p0 = scmp.ne.s32.totalorder %s185_s0, %s77_s10  ;;  %s14_s7 = int_to_ptr.vmem [resolvable:$true] %s13_s7 }
   0x3   :  { %p81_p1 = scmp.lt.u32.totalorder %s77_s10, %s185_s0 }
   0x5   :  { %p83_p2 = pnand %p81_p1, %p78_p0 }
   0x7   :  { %86 = shalt.err (!%p83_p2)
}
   0x8   :  { %s87_s15 = scalar_lea.vmem %s14_s7, 2048  ;;  %p92_p4 = scmp.lt.s32.totalorder %s14_s7, %s14_s7 }
   0x9   :  { %p88_p3 = scmp.ne.s32.totalorder %s14_s7, %s87_s15  ;;  %p93_p5 = scmp.lt.s32.totalorder %s87_s15, %s87_s15 }
   0xb   :  { %p94_p6 = por %p93_p5, %p92_p4 }
   0xd   :  { %p95_p7 = pnand %p94_p6, %p88_p3 }
   0xf   :  { %98 = shalt.err (!%p95_p7)
}
  0x10   :  { %s126_s16 = smov 128   ;;  %s127_s17 = smov 8  }
  0x11   :  { %19 = dma.hbm_to_vmem [thread:$0]  %s185_s0, 2048, %s14_s7, [#allocation3], %s126_s16, %s126_s16, %s127_s17  }
  0x12   :  { %121 = dma.done.wait [#allocation3], 2048  }
  0x13   :  { %122 = vsyncadd [#allocation3], 4294965248  ;;  %vm39_vm0 = vcmask 130048   ;;  %v23_v0 = vld [vmem:[#allocation2] sm:$0xff]  ;;  %v24_v1 = vld [vmem:[#allocation2 + $0x8] sm:$0xff]  ;;  %s128_s20 = smov [#allocation5]  }
  0x14   :  { %v25_v2 = vld [vmem:[#allocation2 + $0x10] sm:$0xff]  ;;  %40 = vst.msk [vmem:[#allocation5] sm:$0xff] %vm39_vm0, %v23_v0  ;;  %41 = vst.msk [vmem:[#allocation5 + $0x8] sm:$0xff] %vm39_vm0, %v24_v1  ;;  %v26_v3 = vld [vmem:[#allocation2 + $0x18] sm:$0xff]  ;;  %s61_s21 = sshll.u32 %s128_s20, 4  ;;  %s62_s21 = int_to_ptr.vmem [resolvable:$true] %s61_s21 }
  0x15   :  { %42 = vst.msk [vmem:[#allocation5 + $0x10] sm:$0xff] %vm39_vm0, %v25_v2  ;;  %v27_v4 = vld [vmem:[#allocation2 + $0x20] sm:$0xff]  ;;  %v28_v5 = vld [vmem:[#allocation2 + $0x28] sm:$0xff]  ;;  %43 = vst.msk [vmem:[#allocation5 + $0x18] sm:$0xff] %vm39_vm0, %v26_v3  ;;  %s99_s0 = scalar_lea.vmem %s62_s21, 2048  ;;  %p104_p9 = scmp.lt.s32.totalorder %s62_s21, %s62_s21 }
  0x16   :  { %44 = vst.msk [vmem:[#allocation5 + $0x20] sm:$0xff] %vm39_vm0, %v27_v4  ;;  %45 = vst.msk [vmem:[#allocation5 + $0x28] sm:$0xff] %vm39_vm0, %v28_v5  ;;  %v29_v6 = vld [vmem:[#allocation2 + $0x30] sm:$0xff]  ;;  %v30_v7 = vld [vmem:[#allocation2 + $0x38] sm:$0xff]  ;;  %p100_p8 = scmp.ne.s32.totalorder %s62_s21, %s99_s0  ;;  %p105_p10 = scmp.lt.s32.totalorder %s99_s0, %s99_s0 }
  0x17   :  { %v31_v8 = vld [vmem:[#allocation2 + $0x40] sm:$0xff]  ;;  %46 = vst.msk [vmem:[#allocation5 + $0x30] sm:$0xff] %vm39_vm0, %v29_v6  ;;  %47 = vst.msk [vmem:[#allocation5 + $0x38] sm:$0xff] %vm39_vm0, %v30_v7  ;;  %v32_v9 = vld [vmem:[#allocation2 + $0x48] sm:$0xff] }
  0x18   :  { %48 = vst.msk [vmem:[#allocation5 + $0x40] sm:$0xff] %vm39_vm0, %v31_v8  ;;  %v33_v10 = vld [vmem:[#allocation2 + $0x50] sm:$0xff]  ;;  %v34_v11 = vld [vmem:[#allocation2 + $0x58] sm:$0xff]  ;;  %49 = vst.msk [vmem:[#allocation5 + $0x48] sm:$0xff] %vm39_vm0, %v32_v9  ;;  %p106_p11 = por %p105_p10, %p104_p9 }
  0x19   :  { %50 = vst.msk [vmem:[#allocation5 + $0x50] sm:$0xff] %vm39_vm0, %v33_v10  ;;  %51 = vst.msk [vmem:[#allocation5 + $0x58] sm:$0xff] %vm39_vm0, %v34_v11  ;;  %v35_v12 = vld [vmem:[#allocation2 + $0x60] sm:$0xff]  ;;  %v36_v13 = vld [vmem:[#allocation2 + $0x68] sm:$0xff] }
  0x1a   :  { %v37_v14 = vld [vmem:[#allocation2 + $0x70] sm:$0xff]  ;;  %52 = vst.msk [vmem:[#allocation5 + $0x60] sm:$0xff] %vm39_vm0, %v35_v12  ;;  %53 = vst.msk [vmem:[#allocation5 + $0x68] sm:$0xff] %vm39_vm0, %v36_v13  ;;  %v38_v15 = vld [vmem:[#allocation2 + $0x78] sm:$0xff]  ;;  %p107_p12 = pnand %p106_p11, %p100_p8 }
  0x1b   :  { %54 = vst.msk [vmem:[#allocation5 + $0x70] sm:$0xff] %vm39_vm0, %v37_v14  ;;  %55 = vst.msk [vmem:[#allocation5 + $0x78] sm:$0xff] %vm39_vm0, %v38_v15 }
  0x1c   :  { %110 = shalt.err (!%p107_p12)
}
  0x1d   :  { %s111_s24 = scalar_lea.hbm %s186_s1, 2048 }
  0x1e   :  { %p112_p13 = scmp.ne.s32.totalorder %s186_s1, %s111_s24  ;;  %p115_p0 = scmp.lt.u32.totalorder %s111_s24, %s186_s1 }
  0x20   :  { %p117_p1 = pnand %p115_p0, %p112_p13 }
  0x22   :  { %120 = shalt.err (!%p117_p1)
}
  0x23   :  { %67 = dma.vmem_to_hbm [thread:$0]  %s62_s21, 2048, %s186_s1, [#allocation4], %s126_s16, %s126_s16, %s127_s17  }
  0x24   :  { %123 = dma.done.wait [#allocation4], 2048  }
  0x25   :  { %124 = vsyncadd [#allocation4], 4294965248 }
  0x26   :  { %71 = vsyncpa [#allocation3], 1 }
  0x27   :  { %72 = vsyncpa [#allocation4], 1 }

</bundles_post_ra>
